<compile_context>
chip_gen: v7x
topology: tpu7x:2x2x1
jax: 0.10.0
libtpu: 0.0.40
codegen_flags: <defaults>
</compile_context>

<pallas_src>
import jax
import jax.numpy as jnp
from jax.experimental import pallas as pl
from jax.experimental.pallas import tpu as pltpu


def _linreg_kernel(x_ref, w_ref, b_ref, o_ref):
    # x_ref: (GB, 128, D) f32    w_ref: (1, 1, D) f32
    # b_ref: (1,) f32 in SMEM    o_ref: (GB, 128) f32  (batch folded into lanes)
    prod = x_ref[...] * w_ref[...]                       # VPU broadcast multiply
    red = jnp.sum(prod, axis=-1)                         # XLU lane reduce -> (GB, 128)
    o_ref[...] = (red + b_ref[0]).astype(o_ref.dtype)    # scalar bias from SMEM


def linear_regression_forward(x, weight, bias, *, max_tile_bytes=4 * 1024 * 1024):
    """x: (B, D) f32; weight: (1, D) (PyTorch nn.Linear layout) or (D,)/(D, 1);
    bias: (1,) f32.  Returns (B,) f32 == squeeze(x @ W.T + b, dim=1)."""
    B, D = x.shape
    w_row = weight.reshape(1, 1, D).astype(x.dtype)
    b = bias.reshape(1).astype(jnp.float32)

    # ---- batch tile selection -------------------------------------------
    # Rows per tile: multiple of 1024 (so folded (GB, 128) blocks keep a
    # sublane count divisible by 8 when tiled), capped so one X buffer stays
    # <= max_tile_bytes (double-buffered => well inside default scoped VMEM).
    tile_rows = max(1024, (max_tile_bytes // (D * 4)) // 1024 * 1024)
    b_pad128 = pl.cdiv(B, 128) * 128        # batch folded into 128-wide lane groups
    tile_rows = min(tile_rows, b_pad128)
    B_padded = pl.cdiv(B, tile_rows) * tile_rows
    # TODO(synk): if D is very large (>~64K f32 per row), add a K reduction grid
    # axis with a VMEM accumulator instead of one (tile_rows, D) block.

    x_p = x if B_padded == B else jnp.pad(x, ((0, B_padded - B), (0, 0)))
    g_total = B_padded // 128
    gb = tile_rows // 128
    x3 = x_p.reshape(g_total, 128, D)       # row-major regrouping, no transpose

    out = pl.pallas_call(
        _linreg_kernel,
        out_shape=jax.ShapeDtypeStruct((g_total, 128), x.dtype),
        grid_spec=pltpu.PrefetchScalarGridSpec(
            num_scalar_prefetch=0,
            grid=(g_total // gb,),
            in_specs=[
                pl.BlockSpec((gb, 128, D), lambda i: (i, 0, 0)),
                pl.BlockSpec((1, 1, D), lambda i: (0, 0, 0)),
                pl.BlockSpec(memory_space=pltpu.MemorySpace.SMEM),
            ],
            out_specs=pl.BlockSpec((gb, 128), lambda i: (i, 0)),
        ),
        compiler_params=pltpu.CompilerParams(
            dimension_semantics=("parallel",),
        ),
    )(x3, w_row, b)

    # squeeze(1) + drop batch padding: (groups, 128) -> (B,)
    return out.reshape(B_padded)[:B]


if __name__ == "__main__":
    key = jax.random.PRNGKey(0)
    k_x, k_w, k_b = jax.random.split(key, 3)

    batch, input_dim = 8, 32

    # Deterministic nn.Linear-style init: U(-1/sqrt(D), 1/sqrt(D)),
    # weight kept in PyTorch (out_features=1, in_features=D) layout.
    bound = 1.0 / (input_dim ** 0.5)
    weight = jax.random.uniform(
        k_w, (1, input_dim), jnp.float32, minval=-bound, maxval=bound)
    bias = jax.random.uniform(
        k_b, (1,), jnp.float32, minval=-bound, maxval=bound)

    x = jax.random.normal(k_x, (batch, input_dim), jnp.float32)

    out = linear_regression_forward(x, weight, bias)
    out = jax.block_until_ready(out)

    # Reference check (plain JAX): squeeze(x @ W.T + b, 1)
    ref = (x @ weight.T + bias).reshape(-1)
    assert out.shape == (batch,)
    assert jnp.allclose(out, ref, atol=1e-5, rtol=1e-5)

    print("KERNEL_OK")
</pallas_src>

<mosaic_0001>
module attributes {stable_mosaic.version = 11 : i64} {
  func.func @_linreg_kernel(%arg0: i32, %arg1: memref<1x128x32xf32, #tpu.memory_space<vmem>>, %arg2: memref<1x1x32xf32, #tpu.memory_space<vmem>>, %arg3: memref<1xf32, #tpu.memory_space<smem>>, %arg4: memref<1x128xf32, #tpu.memory_space<vmem>>) attributes {dimension_semantics = [#tpu.dimension_semantics<parallel>], iteration_bounds = array<i64: 1>, scalar_prefetch = 0 : i64, scratch_operands = 0 : i64, tpu.core_type = #tpu.core_type<tc>, window_params = [{transform_indices = @transform_0, window_bounds = array<i64: 1, 128, 32>}, {pipeline_mode = #tpu.pipeline_mode<synchronous>, transform_indices = @transform_1, window_bounds = array<i64: 1, 1, 32>}, {transform_indices = @transform_2, window_bounds = array<i64: 1>}, {transform_indices = @transform_3, window_bounds = array<i64: 1, 128>}]} {
    %c0 = arith.constant 0 : index
    %c0_0 = arith.constant 0 : index
    %c0_1 = arith.constant 0 : index
    %0 = vector.load %arg1[%c0, %c0_0, %c0_1] : memref<1x128x32xf32, #tpu.memory_space<vmem>>, vector<1x128x32xf32>
    %c0_2 = arith.constant 0 : index
    %c0_3 = arith.constant 0 : index
    %c0_4 = arith.constant 0 : index
    %1 = vector.load %arg2[%c0_2, %c0_3, %c0_4] : memref<1x1x32xf32, #tpu.memory_space<vmem>>, vector<1x1x32xf32>
    %2 = vector.broadcast %1 : vector<1x1x32xf32> to vector<1x128x32xf32>
    %3 = arith.mulf %0, %2 : vector<1x128x32xf32>
    %cst = arith.constant dense<0.000000e+00> : vector<1x128xf32>
    %4 = vector.multi_reduction <add>, %3, %cst [2] : vector<1x128x32xf32> to vector<1x128xf32>
    %c0_5 = arith.constant 0 : index
    %5 = memref.load %arg3[%c0_5] : memref<1xf32, #tpu.memory_space<smem>>
    %6 = vector.broadcast %5 : f32 to vector<1x128xf32>
    %7 = arith.addf %4, %6 : vector<1x128xf32>
    %c0_6 = arith.constant 0 : index
    %c0_7 = arith.constant 0 : index
    %8 = vector.load %arg4[%c0_6, %c0_7] : memref<1x128xf32, #tpu.memory_space<vmem>>, vector<1x128xf32>
    tpu.vector_store %arg4[%c0_6, %c0_7], %7 {strides = array<i32>} : memref<1x128xf32, #tpu.memory_space<vmem>>, vector<1x128xf32>,
    return
  }
  func.func @transform_0(%arg0: i32) -> (i32, i32, i32) {
    %c0_i32 = arith.constant 0 : i32
    %c0_i32_0 = arith.constant 0 : i32
    %c0_i32_1 = arith.constant 0 : i32
    return %arg0, %c0_i32, %c0_i32_0 : i32, i32, i32
  }
  func.func @transform_1(%arg0: i32) -> (i32, i32, i32) {
    %c0_i32 = arith.constant 0 : i32
    %c0_i32_0 = arith.constant 0 : i32
    %c0_i32_1 = arith.constant 0 : i32
    %c0_i32_2 = arith.constant 0 : i32
    return %c0_i32, %c0_i32_0, %c0_i32_1 : i32, i32, i32
  }
  func.func @transform_2(%arg0: i32) -> i32 {
    %c0_i32 = arith.constant 0 : i32
    %c0_i32_0 = arith.constant 0 : i32
    return %c0_i32 : i32
  }
  func.func @transform_3(%arg0: i32) -> (i32, i32) {
    %c0_i32 = arith.constant 0 : i32
    %c0_i32_0 = arith.constant 0 : i32
    return %arg0, %c0_i32 : i32, i32
  }
}

</mosaic_0001>

<bundles_post_ra>
// kernel: tpu_custom_call.1
= control target key start
LH: loop header
LB: loop body
LE: loop exit
PB: predicated region body
PF: predicated region fallthrough
CT: control target
= control target key end

     0   :  { %vm55_vm0 = vcmask 261120   ;;  %s448_s0 = inlined_call_operand.vmem [shape: f32[1,128,32], index: 0, kind: input, shape index: {}]   ;;  %s449_s1 = inlined_call_operand.vmem [shape: f32[1,1,32], index: 1, kind: input, shape index: {}]   ;;  %s450_s2 = inlined_call_operand.<no memory space> [shape: f32[1], index: 2, kind: input, shape index: {}]   ;;  %s451_s3 = inlined_call_operand.hbm [shape: f32[1,128], index: 3, kind: output, shape index: {}]  }
   0x1   :  { %v16_v0 = vld [vmem:[%s448_s0] sm:$0xff]  ;;  %v18_v2 = vld [vmem:[%s448_s0 + $0x10] sm:$0xff]  ;;  %v17_v5 = vld [vmem:[%s448_s0 + $0x8] sm:$0xff] }
   0x2   :  { %v265_v1 = vld [vmem:[%s449_s1] ss:$0 sm:$0xff]  ;;  %v19_v6 = vld [vmem:[%s448_s0 + $0x18] sm:$0xff]  ;;  %v21_v10 = vld [vmem:[%s448_s0 + $0x28] sm:$0xff] }
   0x3   :  { %v39_v3 = vmul.f32 %v265_v1, %v16_v0  ;;  %v41_v4 = vmul.f32 %v265_v1, %v18_v2  ;;  %v40_v7 = vmul.f32 %v265_v1, %v17_v5  ;;  %v42_v8 = vmul.f32 %v265_v1, %v19_v6  ;;  %v20_v9 = vld [vmem:[%s448_s0 + $0x20] sm:$0xff] }
   0x4   :  { %v43_v15 = vmul.f32 %v265_v1, %v20_v9  ;;  %v44_v16 = vmul.f32 %v265_v1, %v21_v10 }
   0x5   :  { %v56_v11 = vsel %vm55_vm0, %v39_v3, 0.0  ;;  %v62_v12 = vsel %vm55_vm0, %v41_v4, 0.0  ;;  %v59_v13 = vsel %vm55_vm0, %v40_v7, 0.0  ;;  %v65_v14 = vsel %vm55_vm0, %v42_v8, 0.0 }
   0x6   :  { %57 = vadd.xlane.f32.xlu0 %v56_v11  ;;  %63 = vadd.xlane.f32.xlu1 %v62_v12 }
   0x7   :  { %9 = vsyncpa [#allocation4], 0  ;;  %v22_v17 = vld [vmem:[%s448_s0 + $0x30] sm:$0xff]  ;;  %v23_v18 = vld [vmem:[%s448_s0 + $0x38] sm:$0xff]  ;;  %v68_v19 = vsel %vm55_vm0, %v43_v15, 0.0  ;;  %v71_v20 = vsel %vm55_vm0, %v44_v16, 0.0  ;;  %v138_v49 = vlaneseq  ;;  %v388_v54 = vstv %s450_s2 }
   0x8   :  { %v45_v21 = vmul.f32 %v265_v1, %v22_v17  ;;  %v46_v22 = vmul.f32 %v265_v1, %v23_v18  ;;  %v24_v23 = vld [vmem:[%s448_s0 + $0x40] sm:$0xff]  ;;  %v25_v24 = vld [vmem:[%s448_s0 + $0x48] sm:$0xff]  ;;  %v26_v29 = vld [vmem:[%s448_s0 + $0x50] sm:$0xff]  ;;  %vm149_vm1 = vcmask 130112   ;;  %vm156_vm2 = vcmask 195712   ;;  %s291_s2 = smov [#allocation3]  }
   0x9   :  { %v47_v27 = vmul.f32 %v265_v1, %v24_v23  ;;  %v48_v28 = vmul.f32 %v265_v1, %v25_v24  ;;  %v27_v30 = vld [vmem:[%s448_s0 + $0x58] sm:$0xff]  ;;  %v49_v33 = vmul.f32 %v265_v1, %v26_v29  ;;  %v28_v35 = vld [vmem:[%s448_s0 + $0x60] sm:$0xff]  ;;  %v29_v36 = vld [vmem:[%s448_s0 + $0x68] sm:$0xff]  ;;  %v379_v50 = vand.u32 127, %v138_v49  ;;  %s257_s19 = sshll.u32 %s291_s2, 4  ;;  %s258_s19 = int_to_ptr.vmem [resolvable:$true] %s257_s19 }
   0xa   :  { %60 = vadd.xlane.f32.xlu0 %v59_v13  ;;  %66 = vadd.xlane.f32.xlu1 %v65_v14  ;;  %v74_v25 = vsel %vm55_vm0, %v45_v21, 0.0  ;;  %v77_v26 = vsel %vm55_vm0, %v46_v22, 0.0  ;;  %v50_v34 = vmul.f32 %v265_v1, %v27_v30  ;;  %v51_v39 = vmul.f32 %v265_v1, %v28_v35  ;;  %v30_v41 = vld [vmem:[%s448_s0 + $0x70] sm:$0xff]  ;;  %v31_v42 = vld [vmem:[%s448_s0 + $0x78] sm:$0xff]  ;;  %s267_s20 = scalar_lea.vmem %s258_s19, 16  ;;  %s271_s21 = scalar_lea.vmem %s258_s19, 32 }
   0xb   :  { %v80_v31 = vsel %vm55_vm0, %v47_v27, 0.0  ;;  %v83_v32 = vsel %vm55_vm0, %v48_v28, 0.0  ;;  %v86_v37 = vsel %vm55_vm0, %v49_v33, 0.0  ;;  %v52_v40 = vmul.f32 %v265_v1, %v29_v36  ;;  %p268_p0 = scmp.ne.s32.totalorder %s258_s19, %s267_s20  ;;  %p272_p1 = scmp.lt.s32.totalorder %s258_s19, %s258_s19 }
   0xc   :  { %v89_v38 = vsel %vm55_vm0, %v50_v34, 0.0  ;;  %v92_v43 = vsel %vm55_vm0, %v51_v39, 0.0  ;;  %v53_v45 = vmul.f32 %v265_v1, %v30_v41  ;;  %v54_v46 = vmul.f32 %v265_v1, %v31_v42  ;;  %p273_p2 = scmp.lt.s32.totalorder %s271_s21, %s267_s20 }
   0xd   :  { %v95_v44 = vsel %vm55_vm0, %v52_v40, 0.0  ;;  %v381_v51 = vshrl.u32 %v138_v49, 7  ;;  %v144_v52 = vadd.s32 4294967288, %v379_v50  ;;  %v158_v53 = vadd.s32 4294967272, %v379_v50 }
   0xe   :  { %69 = vadd.xlane.f32.xlu0 %v68_v19  ;;  %72 = vadd.xlane.f32.xlu1 %v71_v20  ;;  %v98_v47 = vsel %vm55_vm0, %v53_v45, 0.0  ;;  %v101_v48 = vsel %vm55_vm0, %v54_v46, 0.0  ;;  %v151_v56 = vadd.s32 4294967280, %v379_v50  ;;  %v165_v58 = vadd.s32 4294967264, %v379_v50  ;;  %p274_p3 = por %p273_p2, %p272_p1 }
   0xf   :  { %v142_v59 = vsub.s32 %v379_v50, %v381_v51  ;;  %v147_v61 = vsub.s32 %v144_v52, %v381_v51  ;;  %v161_v62 = vsub.s32 %v158_v53, %v381_v51  ;;  %v172_v3 = vadd.s32 4294967256, %v379_v50 }
  0x10   :  { %v154_v63 = vsub.s32 %v151_v56, %v381_v51  ;;  %v168_v6 = vsub.s32 %v165_v58, %v381_v51  ;;  %v179_v10 = vadd.s32 4294967248, %v379_v50  ;;  %vm163_vm3 = vcmask 261312   ;;  %p275_p4 = pnand %p274_p3, %p268_p0 }
  0x11   :  { %v175_v13 = vsub.s32 %v172_v3, %v381_v51  ;;  %v186_v15 = vadd.s32 4294967240, %v379_v50  ;;  %vm170_vm4 = vcmask 326912   ;;  %v193_v23 = vadd.s32 4294967232, %v379_v50 }
  0x12   :  { %75 = vadd.xlane.f32.xlu0 %v74_v25  ;;  %78 = vadd.xlane.f32.xlu1 %v77_v26  ;;  %v182_v22 = vsub.s32 %v179_v10, %v381_v51  ;;  %v200_v28 = vadd.s32 4294967224, %v379_v50  ;;  %vm177_vm5 = vcmask 392512   ;;  %vm184_vm6 = vcmask 458112  }
  0x13   :  { %v189_v26 = vsub.s32 %v186_v15, %v381_v51  ;;  %v196_v33 = vsub.s32 %v193_v23, %v381_v51  ;;  %v207_v34 = vadd.s32 4294967216, %v379_v50  ;;  %v214_v40 = vadd.s32 4294967208, %v379_v50 }
  0x14   :  { %vm191_vm7 = vcmask 523712   ;;  %vm198_vm8 = vcmask 589312   ;;  %v221_v46 = vadd.s32 4294967200, %v379_v50  ;;  %vm205_vm9 = vcmask 654912  }
  0x15   :  { %v210_v45 = vsub.s32 %v207_v34, %v381_v51  ;;  %v217_v52 = vsub.s32 %v214_v40, %v381_v51  ;;  %vm212_vm10 = vcmask 720512   ;;  %vm219_vm11 = vcmask 786112  }
  0x16   :  { %81 = vadd.xlane.f32.xlu0 %v80_v31  ;;  %84 = vadd.xlane.f32.xlu1 %v83_v32  ;;  %vm226_vm12 = vcmask 851712   ;;  %vm233_vm13 = vcmask 917312   ;;  %vm240_vm14 = vcmask 982912   ;;  %vm247_vm15 = vcmask 1048512  }
  0x1a   :  { %87 = vadd.xlane.f32.xlu0 %v86_v37  ;;  %90 = vadd.xlane.f32.xlu1 %v89_v38  ;;  %v203_v38 = vsub.s32 %v200_v28, %v381_v51 }
  0x1e   :  { %93 = vadd.xlane.f32.xlu0 %v92_v43  ;;  %96 = vadd.xlane.f32.xlu1 %v95_v44 }
  0x22   :  { %99 = vadd.xlane.f32.xlu0 %v98_v47  ;;  %102 = vadd.xlane.f32.xlu1 %v101_v48 }
  0x93   :  { %v58_v55 = vpop.xlane.xlu0 %57  ;;  %v64_v57 = vpop.xlane.xlu1 %63 }
  0x94   :  { %v106_v60 = vadd.f32 %v388_v54, %v58_v55  ;;  %v108_v0 = vadd.f32 %v388_v54, %v64_v57  ;;  %v228_v55 = vadd.s32 4294967192, %v379_v50 }
  0x96   :  { %v143_v7 = vrot.slane %v106_v60, %v142_v59  ;;  %v155_v11 = vrot.slane %v108_v0, %v154_v63  ;;  %v224_v60 = vsub.s32 %v221_v46, %v381_v51 }
  0x97   :  { %v61_v1 = vpop.xlane.xlu0 %60  ;;  %v67_v2 = vpop.xlane.xlu1 %66 }
  0x98   :  { %v107_v4 = vadd.f32 %v388_v54, %v61_v1  ;;  %v109_v5 = vadd.f32 %v388_v54, %v67_v2  ;;  %v231_v2 = vsub.s32 %v228_v55, %v381_v51 }
  0x9a   :  { %v148_v8 = vrot.slane %v107_v4, %v147_v61  ;;  %v162_v9 = vrot.slane %v109_v5, %v161_v62  ;;  %v235_v61 = vadd.s32 4294967184, %v379_v50  ;;  %v242_v62 = vadd.s32 4294967176, %v379_v50 }
  0x9b   :  { %v70_v12 = vpop.xlane.xlu0 %69  ;;  %v73_v14 = vpop.xlane.xlu1 %72 }
  0x9c   :  { %v150_v16 = vsel %vm149_vm1, %v148_v8, %v143_v7  ;;  %v110_v17 = vadd.f32 %v388_v54, %v70_v12  ;;  %v111_v18 = vadd.f32 %v388_v54, %v73_v14  ;;  %v238_v8 = vsub.s32 %v235_v61, %v381_v51 }
  0x9d   :  { %v157_v19 = vsel %vm156_vm2, %v155_v11, %v150_v16 }
  0x9e   :  { %v164_v20 = vsel %vm163_vm3, %v162_v9, %v157_v19  ;;  %v169_v21 = vrot.slane %v110_v17, %v168_v6  ;;  %v176_v24 = vrot.slane %v111_v18, %v175_v13  ;;  %v245_v9 = vsub.s32 %v242_v62, %v381_v51 }
  0x9f   :  { %v76_v25 = vpop.xlane.xlu0 %75  ;;  %v79_v27 = vpop.xlane.xlu1 %78 }
  0xa0   :  { %v171_v29 = vsel %vm170_vm4, %v169_v21, %v164_v20  ;;  %v112_v30 = vadd.f32 %v388_v54, %v76_v25  ;;  %v113_v31 = vadd.f32 %v388_v54, %v79_v27 }
  0xa1   :  { %v178_v35 = vsel %vm177_vm5, %v176_v24, %v171_v29 }
  0xa2   :  { %v183_v32 = vrot.slane %v112_v30, %v182_v22  ;;  %v190_v36 = vrot.slane %v113_v31, %v189_v26 }
  0xa3   :  { %v82_v37 = vpop.xlane.xlu0 %81  ;;  %v85_v39 = vpop.xlane.xlu1 %84 }
  0xa4   :  { %v185_v41 = vsel %vm184_vm6, %v183_v32, %v178_v35  ;;  %v114_v42 = vadd.f32 %v388_v54, %v82_v37  ;;  %v115_v43 = vadd.f32 %v388_v54, %v85_v39 }
  0xa5   :  { %v192_v47 = vsel %vm191_vm7, %v190_v36, %v185_v41 }
  0xa6   :  { %v197_v44 = vrot.slane %v114_v42, %v196_v33  ;;  %v204_v48 = vrot.slane %v115_v43, %v203_v38 }
  0xa7   :  { %v88_v49 = vpop.xlane.xlu0 %87  ;;  %v91_v53 = vpop.xlane.xlu1 %90 }
  0xa8   :  { %v199_v56 = vsel %vm198_vm8, %v197_v44, %v192_v47  ;;  %v116_v57 = vadd.f32 %v388_v54, %v88_v49  ;;  %v117_v58 = vadd.f32 %v388_v54, %v91_v53 }
  0xa9   :  { %v206_v63 = vsel %vm205_vm9, %v204_v48, %v199_v56 }
  0xaa   :  { %v211_v59 = vrot.slane %v116_v57, %v210_v45  ;;  %v218_v0 = vrot.slane %v117_v58, %v217_v52 }
  0xab   :  { %v94_v1 = vpop.xlane.xlu0 %93  ;;  %v97_v3 = vpop.xlane.xlu1 %96 }
  0xac   :  { %v213_v4 = vsel %vm212_vm10, %v211_v59, %v206_v63  ;;  %v118_v5 = vadd.f32 %v388_v54, %v94_v1  ;;  %v119_v6 = vadd.f32 %v388_v54, %v97_v3 }
  0xad   :  { %v220_v10 = vsel %vm219_vm11, %v218_v0, %v213_v4 }
  0xae   :  { %v225_v7 = vrot.slane %v118_v5, %v224_v60  ;;  %v232_v50 = vrot.slane %v119_v6, %v231_v2 }
  0xaf   :  { %v100_v11 = vpop.xlane.xlu0 %99  ;;  %v103_v12 = vpop.xlane.xlu1 %102 }
  0xb0   :  { %v227_v13 = vsel %vm226_vm12, %v225_v7, %v220_v10  ;;  %v120_v14 = vadd.f32 %v388_v54, %v100_v11  ;;  %v121_v15 = vadd.f32 %v388_v54, %v103_v12 }
  0xb1   :  { %v234_v18 = vsel %vm233_vm13, %v232_v50, %v227_v13 }
  0xb2   :  { %v239_v16 = vrot.slane %v120_v14, %v238_v8  ;;  %v246_v17 = vrot.slane %v121_v15, %v245_v9 }
  0xb4   :  { %v241_v19 = vsel %vm240_vm14, %v239_v16, %v234_v18 }
  0xb5   :  { %v248_v51 = vsel %vm247_vm15, %v246_v17, %v241_v19 }
  0xb6   :  { %250 = vst [vmem:[#allocation3] sm:$0x1] %v248_v51 }
  0xb7   :  { %278 = shalt.err (!%p275_p4)
}
  0xb8   :  { %s279_s1 = scalar_lea.hbm %s451_s3, 16 }
  0xb9   :  { %p280_p5 = scmp.ne.s32.totalorder %s451_s3, %s279_s1  ;;  %p283_p6 = scmp.lt.u32.totalorder %s279_s1, %s451_s3 }
  0xbb   :  { %p285_p7 = pnand %p283_p6, %p280_p5 }
  0xbd   :  { %288 = shalt.err (!%p285_p7)
}
  0xbe   :  { %260 = dma.vmem_to_hbm [thread:$0]  %s258_s19, 16, %s451_s3, [#allocation4]  }
  0xbf   :  { %289 = dma.done.wait [#allocation4], 16  }
  0xc0   :  { %290 = vsyncadd [#allocation4], 4294967280 }
  0xc1   :  { %264 = vsyncpa [#allocation4], 1 }

</bundles_post_ra>
